<compile_context>
chip_gen: v7x
topology: tpu7x:2x2x1
jax: 0.10.0
libtpu: 0.0.40
codegen_flags: <defaults>
</compile_context>

<pallas_src>
import functools

import jax
import jax.numpy as jnp
from jax.experimental import pallas as pl
from jax.experimental.pallas import tpu as pltpu


# --------------------------------------------------------------------------- kernels
def _mlp_kernel_2layer(x_ref, w1_ref, b1_ref, w2_ref, b2_ref, o_ref):
    # fc1 + sigmoid (bf16 matmul, f32 accumulate, f32 elementwise)
    h = jnp.dot(x_ref[...], w1_ref[...], preferred_element_type=jnp.float32)
    h = jax.nn.sigmoid(h + b1_ref[...])
    # fc2 + sigmoid
    o = jnp.dot(h.astype(w2_ref.dtype), w2_ref[...], preferred_element_type=jnp.float32)
    o_ref[...] = jax.nn.sigmoid(o + b2_ref[...]).astype(o_ref.dtype)


def _mlp_kernel_3layer(x_ref, w1_ref, b1_ref, w3_ref, b3_ref, w2_ref, b2_ref, o_ref):
    # fc1 + sigmoid
    h = jnp.dot(x_ref[...], w1_ref[...], preferred_element_type=jnp.float32)
    h = jax.nn.sigmoid(h + b1_ref[...])
    # fc3 + sigmoid (num_layer == 2 branch in the PyTorch module)
    h = jnp.dot(h.astype(w3_ref.dtype), w3_ref[...], preferred_element_type=jnp.float32)
    h = jax.nn.sigmoid(h + b3_ref[...])
    # fc2 + sigmoid
    o = jnp.dot(h.astype(w2_ref.dtype), w2_ref[...], preferred_element_type=jnp.float32)
    o_ref[...] = jax.nn.sigmoid(o + b2_ref[...]).astype(o_ref.dtype)


# --------------------------------------------------------------------------- wrapper
def _round_up(x, m):
    return (x + m - 1) // m * m


def _pick_batch_tile(batch):
    # Large batches: big tiles (fewer grid steps, better pipeline efficiency) while keeping
    # padding waste bounded.  Tiny batches: one 8-aligned tile, no tiling overhead.
    if batch >= 1024:
        return 512
    if batch >= 512:
        return 256
    if batch >= 256:
        return 128
    return _round_up(batch, 8)


@functools.partial(jax.jit, static_argnames=("num_layer",))
def net_forward(x, params, num_layer):
    """Pallas implementation of Net.forward.

    params: dict with keys w1,b1,(w3,b3 if num_layer==2),w2,b2.
    Weights are (in_features, out_features); biases are (1, out_features).
    """
    batch, input_size = x.shape
    hidden_size = params["w1"].shape[1]
    num_classes = params["w2"].shape[1]

    # Lane-dense padded feature dims (multiples of 128).
    in_p = _round_up(input_size, 128)
    hid_p = _round_up(hidden_size, 128)
    cls_p = _round_up(num_classes, 128)

    tile_m = _pick_batch_tile(batch)
    batch_p = _round_up(batch, tile_m)
    grid = (pl.cdiv(batch_p, tile_m),)

    def pad2(a, rows, cols, dtype):
        a = a.astype(dtype)
        return jnp.pad(a, ((0, rows - a.shape[0]), (0, cols - a.shape[1])))

    # Matmul operands in bf16 (f32 accumulation inside the kernel); biases stay f32.
    x_p = pad2(x, batch_p, in_p, jnp.bfloat16)
    w1 = pad2(params["w1"], in_p, hid_p, jnp.bfloat16)
    b1 = pad2(params["b1"], 1, hid_p, jnp.float32)
    w2 = pad2(params["w2"], hid_p, cls_p, jnp.bfloat16)
    b2 = pad2(params["b2"], 1, cls_p, jnp.float32)

    # x / out: one tile per grid step. Weights & biases: constant index map -> VMEM-resident.
    x_spec = pl.BlockSpec((tile_m, in_p), lambda i: (i, 0))
    out_spec = pl.BlockSpec((tile_m, cls_p), lambda i: (i, 0))

    def const_spec(shape):
        return pl.BlockSpec(shape, lambda i: (0, 0))

    if num_layer == 2:
        w3 = pad2(params["w3"], hid_p, hid_p, jnp.bfloat16)
        b3 = pad2(params["b3"], 1, hid_p, jnp.float32)
        kernel = _mlp_kernel_3layer
        args = (x_p, w1, b1, w3, b3, w2, b2)
        in_specs = [
            x_spec,
            const_spec((in_p, hid_p)), const_spec((1, hid_p)),
            const_spec((hid_p, hid_p)), const_spec((1, hid_p)),
            const_spec((hid_p, cls_p)), const_spec((1, cls_p)),
        ]
        flops = 2 * batch_p * (in_p * hid_p + hid_p * hid_p + hid_p * cls_p)
        transcendentals = batch_p * (2 * hid_p + cls_p)
    else:
        kernel = _mlp_kernel_2layer
        args = (x_p, w1, b1, w2, b2)
        in_specs = [
            x_spec,
            const_spec((in_p, hid_p)), const_spec((1, hid_p)),
            const_spec((hid_p, cls_p)), const_spec((1, cls_p)),
        ]
        flops = 2 * batch_p * (in_p * hid_p + hid_p * cls_p)
        transcendentals = batch_p * (hid_p + cls_p)

    bytes_accessed = sum(int(a.size) * a.dtype.itemsize for a in args)
    bytes_accessed += batch_p * cls_p * 4  # f32 output

    out_padded = pl.pallas_call(
        kernel,
        out_shape=jax.ShapeDtypeStruct((batch_p, cls_p), jnp.float32),
        grid=grid,
        in_specs=in_specs,
        out_specs=out_spec,
        compiler_params=pltpu.CompilerParams(
            dimension_semantics=("parallel",),   # batch tiles are independent (megacore split)
            vmem_limit_bytes=32 * 1024 * 1024,   # safe on v5e/v6e (128 MiB) and v7x (64 MiB)
        ),
        cost_estimate=pl.CostEstimate(
            flops=flops,
            transcendentals=transcendentals,
            bytes_accessed=bytes_accessed,
        ),
    )(*args)

    # Drop batch / class padding.
    return out_padded[:batch, :num_classes]


# --------------------------------------------------------------------------- params / reference
def init_params(key, input_size, hidden_size, num_classes, num_layer):
    """Deterministic init mimicking nn.Linear (uniform(-1/sqrt(fan_in), 1/sqrt(fan_in)))."""
    def linear(k, fan_in, fan_out):
        kw, kb = jax.random.split(k)
        bound = 1.0 / jnp.sqrt(jnp.float32(fan_in))
        # stored as (in, out) so the kernel does x @ W directly
        w = jax.random.uniform(kw, (fan_in, fan_out), jnp.float32, -bound, bound)
        b = jax.random.uniform(kb, (1, fan_out), jnp.float32, -bound, bound)
        return w, b

    k1, k2, k3 = jax.random.split(key, 3)
    params = {}
    params["w1"], params["b1"] = linear(k1, input_size, hidden_size)
    if num_layer == 2:
        params["w3"], params["b3"] = linear(k3, hidden_size, hidden_size)
    params["w2"], params["b2"] = linear(k2, hidden_size, num_classes)
    return params


def reference_forward(x, params, num_layer):
    h = jax.nn.sigmoid(x @ params["w1"] + params["b1"])
    if num_layer == 2:
        h = jax.nn.sigmoid(h @ params["w3"] + params["b3"])
    return jax.nn.sigmoid(h @ params["w2"] + params["b2"])


# --------------------------------------------------------------------------- main
if __name__ == "__main__":
    input_size, hidden_size, num_classes, num_layer = 32, 32, 8, 2
    batch = 8

    key = jax.random.PRNGKey(0)
    kx, kp = jax.random.split(key)
    x = jax.random.normal(kx, (batch, input_size), jnp.float32)
    params = init_params(kp, input_size, hidden_size, num_classes, num_layer)

    out = net_forward(x, params, num_layer)
    jax.block_until_ready(out)

    ref = reference_forward(x, params, num_layer)
    assert out.shape == (batch, num_classes)
    # bf16 matmul operands (f32 accumulation) vs. the pure-f32 reference: small abs tolerance
    # on the post-sigmoid outputs.
    assert jnp.allclose(out, ref, atol=1.5e-2, rtol=1e-2), float(jnp.max(jnp.abs(out - ref)))

    # Also exercise the 1-hidden-layer path and a larger, multi-tile batch.
    params1 = init_params(kp, input_size, hidden_size, num_classes, 1)
    big_batch = 1536
    xb = jax.random.normal(kx, (big_batch, input_size), jnp.float32)
    outb = net_forward(xb, params1, 1)
    jax.block_until_ready(outb)
    refb = reference_forward(xb, params1, 1)
    assert outb.shape == (big_batch, num_classes)
    assert jnp.allclose(outb, refb, atol=1.5e-2, rtol=1e-2), float(jnp.max(jnp.abs(outb - refb)))

    print("KERNEL_OK")
</pallas_src>

<mosaic_0001>
module attributes {stable_mosaic.version = 11 : i64} {
  func.func @_mlp_kernel_3layer(%arg0: i32, %arg1: memref<8x128xbf16, #tpu.memory_space<vmem>>, %arg2: memref<128x128xbf16, #tpu.memory_space<vmem>>, %arg3: memref<1x128xf32, #tpu.memory_space<vmem>>, %arg4: memref<128x128xbf16, #tpu.memory_space<vmem>>, %arg5: memref<1x128xf32, #tpu.memory_space<vmem>>, %arg6: memref<128x128xbf16, #tpu.memory_space<vmem>>, %arg7: memref<1x128xf32, #tpu.memory_space<vmem>>, %arg8: memref<8x128xf32, #tpu.memory_space<vmem>>) attributes {dimension_semantics = [#tpu.dimension_semantics<parallel>], iteration_bounds = array<i64: 1>, scalar_prefetch = 0 : i64, scratch_operands = 0 : i64, tpu.core_type = #tpu.core_type<tc>, window_params = [{transform_indices = @transform_0, window_bounds = array<i64: 8, 128>}, {pipeline_mode = #tpu.pipeline_mode<synchronous>, transform_indices = @transform_1, window_bounds = array<i64: 128, 128>}, {pipeline_mode = #tpu.pipeline_mode<synchronous>, transform_indices = @transform_2, window_bounds = array<i64: 1, 128>}, {pipeline_mode = #tpu.pipeline_mode<synchronous>, transform_indices = @transform_3, window_bounds = array<i64: 128, 128>}, {pipeline_mode = #tpu.pipeline_mode<synchronous>, transform_indices = @transform_4, window_bounds = array<i64: 1, 128>}, {pipeline_mode = #tpu.pipeline_mode<synchronous>, transform_indices = @transform_5, window_bounds = array<i64: 128, 128>}, {pipeline_mode = #tpu.pipeline_mode<synchronous>, transform_indices = @transform_6, window_bounds = array<i64: 1, 128>}, {transform_indices = @transform_7, window_bounds = array<i64: 8, 128>}]} {
    %c0 = arith.constant 0 : index
    %c0_0 = arith.constant 0 : index
    %0 = vector.load %arg1[%c0, %c0_0] : memref<8x128xbf16, #tpu.memory_space<vmem>>, vector<8x128xbf16>
    %c0_1 = arith.constant 0 : index
    %c0_2 = arith.constant 0 : index
    %1 = vector.load %arg2[%c0_1, %c0_2] : memref<128x128xbf16, #tpu.memory_space<vmem>>, vector<128x128xbf16>
    %cst = arith.constant dense<0.000000e+00> : vector<8x128xf32>
    %2 = tpu.matmul %0, %1, %cst {dimension_numbers = #tpu.dot_dimension_numbers<[1], [0], [0], [1], [0, 0, 1, 1], [], []>} : vector<8x128xbf16>, vector<128x128xbf16>, vector<8x128xf32> -> vector<8x128xf32>
    %c0_3 = arith.constant 0 : index
    %c0_4 = arith.constant 0 : index
    %3 = vector.load %arg3[%c0_3, %c0_4] : memref<1x128xf32, #tpu.memory_space<vmem>>, vector<1x128xf32>
    %4 = vector.broadcast %3 : vector<1x128xf32> to vector<8x128xf32>
    %5 = arith.addf %2, %4 : vector<8x128xf32>
    %6 = arith.negf %5 : vector<8x128xf32>
    %7 = math.exp %6 : vector<8x128xf32>
    %cst_5 = arith.constant 1.000000e+00 : f32
    %8 = vector.broadcast %cst_5 : f32 to vector<8x128xf32>
    %9 = arith.addf %8, %7 : vector<8x128xf32>
    %10 = arith.divf %8, %9 : vector<8x128xf32>
    %11 = arith.truncf %10 : vector<8x128xf32> to vector<8x128xbf16>
    %c0_6 = arith.constant 0 : index
    %c0_7 = arith.constant 0 : index
    %12 = vector.load %arg4[%c0_6, %c0_7] : memref<128x128xbf16, #tpu.memory_space<vmem>>, vector<128x128xbf16>
    %cst_8 = arith.constant dense<0.000000e+00> : vector<8x128xf32>
    %13 = tpu.matmul %11, %12, %cst_8 {dimension_numbers = #tpu.dot_dimension_numbers<[1], [0], [0], [1], [0, 0, 1, 1], [], []>} : vector<8x128xbf16>, vector<128x128xbf16>, vector<8x128xf32> -> vector<8x128xf32>
    %c0_9 = arith.constant 0 : index
    %c0_10 = arith.constant 0 : index
    %14 = vector.load %arg5[%c0_9, %c0_10] : memref<1x128xf32, #tpu.memory_space<vmem>>, vector<1x128xf32>
    %15 = vector.broadcast %14 : vector<1x128xf32> to vector<8x128xf32>
    %16 = arith.addf %13, %15 : vector<8x128xf32>
    %17 = arith.negf %16 : vector<8x128xf32>
    %18 = math.exp %17 : vector<8x128xf32>
    %cst_11 = arith.constant 1.000000e+00 : f32
    %19 = vector.broadcast %cst_11 : f32 to vector<8x128xf32>
    %20 = arith.addf %19, %18 : vector<8x128xf32>
    %21 = arith.divf %19, %20 : vector<8x128xf32>
    %22 = arith.truncf %21 : vector<8x128xf32> to vector<8x128xbf16>
    %c0_12 = arith.constant 0 : index
    %c0_13 = arith.constant 0 : index
    %23 = vector.load %arg6[%c0_12, %c0_13] : memref<128x128xbf16, #tpu.memory_space<vmem>>, vector<128x128xbf16>
    %cst_14 = arith.constant dense<0.000000e+00> : vector<8x128xf32>
    %24 = tpu.matmul %22, %23, %cst_14 {dimension_numbers = #tpu.dot_dimension_numbers<[1], [0], [0], [1], [0, 0, 1, 1], [], []>} : vector<8x128xbf16>, vector<128x128xbf16>, vector<8x128xf32> -> vector<8x128xf32>
    %c0_15 = arith.constant 0 : index
    %c0_16 = arith.constant 0 : index
    %25 = vector.load %arg7[%c0_15, %c0_16] : memref<1x128xf32, #tpu.memory_space<vmem>>, vector<1x128xf32>
    %26 = vector.broadcast %25 : vector<1x128xf32> to vector<8x128xf32>
    %27 = arith.addf %24, %26 : vector<8x128xf32>
    %28 = arith.negf %27 : vector<8x128xf32>
    %29 = math.exp %28 : vector<8x128xf32>
    %cst_17 = arith.constant 1.000000e+00 : f32
    %30 = vector.broadcast %cst_17 : f32 to vector<8x128xf32>
    %31 = arith.addf %30, %29 : vector<8x128xf32>
    %32 = arith.divf %30, %31 : vector<8x128xf32>
    %c0_18 = arith.constant 0 : index
    %c0_19 = arith.constant 0 : index
    %33 = vector.load %arg8[%c0_18, %c0_19] : memref<8x128xf32, #tpu.memory_space<vmem>>, vector<8x128xf32>
    tpu.vector_store %arg8[%c0_18, %c0_19], %32 {strides = array<i32>} : memref<8x128xf32, #tpu.memory_space<vmem>>, vector<8x128xf32>,
    return
  }
  func.func @transform_0(%arg0: i32) -> (i32, i32) {
    %c0_i32 = arith.constant 0 : i32
    %c0_i32_0 = arith.constant 0 : i32
    return %arg0, %c0_i32 : i32, i32
  }
  func.func @transform_1(%arg0: i32) -> (i32, i32) {
    %c0_i32 = arith.constant 0 : i32
    %c0_i32_0 = arith.constant 0 : i32
    %c0_i32_1 = arith.constant 0 : i32
    return %c0_i32, %c0_i32_0 : i32, i32
  }
  func.func @transform_2(%arg0: i32) -> (i32, i32) {
    %c0_i32 = arith.constant 0 : i32
    %c0_i32_0 = arith.constant 0 : i32
    %c0_i32_1 = arith.constant 0 : i32
    return %c0_i32, %c0_i32_0 : i32, i32
  }
  func.func @transform_3(%arg0: i32) -> (i32, i32) {
    %c0_i32 = arith.constant 0 : i32
    %c0_i32_0 = arith.constant 0 : i32
    %c0_i32_1 = arith.constant 0 : i32
    return %c0_i32, %c0_i32_0 : i32, i32
  }
  func.func @transform_4(%arg0: i32) -> (i32, i32) {
    %c0_i32 = arith.constant 0 : i32
    %c0_i32_0 = arith.constant 0 : i32
    %c0_i32_1 = arith.constant 0 : i32
    return %c0_i32, %c0_i32_0 : i32, i32
  }
  func.func @transform_5(%arg0: i32) -> (i32, i32) {
    %c0_i32 = arith.constant 0 : i32
    %c0_i32_0 = arith.constant 0 : i32
    %c0_i32_1 = arith.constant 0 : i32
    return %c0_i32, %c0_i32_0 : i32, i32
  }
  func.func @transform_6(%arg0: i32) -> (i32, i32) {
    %c0_i32 = arith.constant 0 : i32
    %c0_i32_0 = arith.constant 0 : i32
    %c0_i32_1 = arith.constant 0 : i32
    return %c0_i32, %c0_i32_0 : i32, i32
  }
  func.func @transform_7(%arg0: i32) -> (i32, i32) {
    %c0_i32 = arith.constant 0 : i32
    %c0_i32_0 = arith.constant 0 : i32
    return %arg0, %c0_i32 : i32, i32
  }
}

</mosaic_0001>

<bundles_post_ra>
// kernel: net_forward.1
= control target key start
LH: loop header
LB: loop body
LE: loop exit
PB: predicated region body
PF: predicated region fallthrough
CT: control target
= control target key end

     0   :  { %v577_v1 = vmov 0.0   ;;  %vm578_vm0 = vmmov 0   ;;  %s746_s0 = inlined_call_operand.vmem [shape: bf16[8,128], index: 0, kind: input, shape index: {}]   ;;  %s747_s1 = inlined_call_operand.vmem [shape: bf16[128,128], index: 1, kind: input, shape index: {}]   ;;  %s748_s2 = inlined_call_operand.vmem [shape: f32[1,128], index: 2, kind: input, shape index: {}]   ;;  %s749_s3 = inlined_call_operand.vmem [shape: bf16[128,128], index: 3, kind: input, shape index: {}]   ;;  %s750_s4 = inlined_call_operand.vmem [shape: f32[1,128], index: 4, kind: input, shape index: {}]   ;;  %s751_s5 = inlined_call_operand.vmem [shape: bf16[128,128], index: 5, kind: input, shape index: {}]   ;;  %s752_s6 = inlined_call_operand.vmem [shape: f32[1,128], index: 6, kind: input, shape index: {}]   ;;  %s753_s7 = inlined_call_operand.hbm [shape: f32[8,128], index: 7, kind: output, shape index: {}]  }
   0x1   :  { %v517_v0 = vld [vmem:[%s747_s1] sm:$0xff]   ;;  %454 = vmatprep.subr.bf16.mxu0 %v577_v1  ;;  %474 = vmatprep.subr.bf16.mxu1 %v577_v1  ;;  %v518_v2 = vld [vmem:[%s747_s1 + $0x8] sm:$0xff]   ;;  %v519_v3 = vld [vmem:[%s747_s1 + $0x10] sm:$0xff]  }
   0x2   :  { %455 = vmatpush3.bf16.msra.mxu0 %v517_v0  ;;  %470 = vmatprep.mubr.msk.bf16.mxu0 %vm578_vm0, %v577_v1  ;;  %v520_v4 = vld [vmem:[%s747_s1 + $0x18] sm:$0xff]   ;;  %v521_v5 = vld [vmem:[%s747_s1 + $0x20] sm:$0xff]   ;;  %v522_v6 = vld [vmem:[%s747_s1 + $0x28] sm:$0xff]  }
   0x3   :  { %456 = vmatprep.subr.bf16.mxu0 %v577_v1  ;;  %490 = vmatprep.mubr.msk.bf16.mxu1 %vm578_vm0, %v577_v1 }
   0x6   :  { %457 = vmatpush3.bf16.msra.mxu0 %v518_v2 }
   0x7   :  { %458 = vmatprep.subr.bf16.mxu0 %v577_v1 }
   0xa   :  { %459 = vmatpush3.bf16.msra.mxu0 %v519_v3 }
   0xb   :  { %460 = vmatprep.subr.bf16.mxu0 %v577_v1 }
   0xe   :  { %461 = vmatpush3.bf16.msra.mxu0 %v520_v4 }
   0xf   :  { %462 = vmatprep.subr.bf16.mxu0 %v577_v1 }
  0x12   :  { %463 = vmatpush3.bf16.msra.mxu0 %v521_v5 }
  0x13   :  { %464 = vmatprep.subr.bf16.mxu0 %v577_v1 }
  0x14   :  { %12 = vsyncpa [#allocation3], 0  ;;  %v523_v7 = vld [vmem:[%s747_s1 + $0x30] sm:$0xff]   ;;  %v524_v8 = vld [vmem:[%s747_s1 + $0x38] sm:$0xff]  }
  0x15   :  { %v28_v9 = vld [vmem:[%s746_s0] sm:$0xf]  ;;  %v526_v11 = vld [vmem:[%s749_s3 + $0x8] sm:$0xff]   ;;  %v527_v12 = vld [vmem:[%s749_s3 + $0x10] sm:$0xff]  }
  0x16   :  { %465 = vmatpush3.bf16.msra.mxu0 %v522_v6  ;;  %v525_v10 = vld [vmem:[%s749_s3] sm:$0xff]   ;;  %v528_v13 = vld [vmem:[%s749_s3 + $0x18] sm:$0xff]   ;;  %v530_v15 = vld [vmem:[%s749_s3 + $0x28] sm:$0xff]  }
  0x17   :  { %466 = vmatprep.subr.bf16.mxu0 %v577_v1  ;;  %475 = vmatpush3.bf16.msra.mxu1 %v525_v10  ;;  %v529_v14 = vld [vmem:[%s749_s3 + $0x20] sm:$0xff]   ;;  %v531_v16 = vld [vmem:[%s749_s3 + $0x30] sm:$0xff]   ;;  %v532_v17 = vld [vmem:[%s749_s3 + $0x38] sm:$0xff]  }
  0x18   :  { %476 = vmatprep.subr.bf16.mxu1 %v577_v1  ;;  %v397_v18 = vld [vmem:[%s748_s2] ss:$0 sm:$0xff]  ;;  %v534_v30 = vld [vmem:[%s751_s5 + $0x8] sm:$0xff]   ;;  %v535_v31 = vld [vmem:[%s751_s5 + $0x10] sm:$0xff]  }
  0x19   :  { %v533_v29 = vld [vmem:[%s751_s5] sm:$0xff]   ;;  %v536_v32 = vld [vmem:[%s751_s5 + $0x18] sm:$0xff]   ;;  %v538_v34 = vld [vmem:[%s751_s5 + $0x28] sm:$0xff]  }
  0x1a   :  { %467 = vmatpush3.bf16.msra.mxu0 %v523_v7  ;;  %v537_v33 = vld [vmem:[%s751_s5 + $0x20] sm:$0xff]   ;;  %v539_v35 = vld [vmem:[%s751_s5 + $0x30] sm:$0xff]   ;;  %v540_v36 = vld [vmem:[%s751_s5 + $0x38] sm:$0xff]  }
  0x1b   :  { %468 = vmatprep.subr.bf16.mxu0 %v577_v1  ;;  %477 = vmatpush3.bf16.msra.mxu1 %v526_v11  ;;  %v407_v37 = vld [vmem:[%s750_s4] ss:$0 sm:$0xff]  ;;  %s579_s4 = smov [#allocation2]  }
  0x1c   :  { %478 = vmatprep.subr.bf16.mxu1 %v577_v1  ;;  %v417_v48 = vld [vmem:[%s752_s6] ss:$0 sm:$0xff]  ;;  %s389_s27 = sshll.u32 %s579_s4, 4  ;;  %s390_s27 = int_to_ptr.vmem [resolvable:$true] %s389_s27 }
  0x1d   :  { %s553_s28 = scalar_lea.vmem %s390_s27, 128  ;;  %p558_p1 = scmp.lt.s32.totalorder %s390_s27, %s390_s27 }
  0x1e   :  { %469 = vmatpush3.bf16.msra.mxu0 %v524_v8  ;;  %p554_p0 = scmp.ne.s32.totalorder %s390_s27, %s553_s28  ;;  %p559_p2 = scmp.lt.s32.totalorder %s553_s28, %s553_s28 }
  0x1f   :  { %494 = vmatprep.subr.bf16.mxu0 %v577_v1  ;;  %479 = vmatpush3.bf16.msra.mxu1 %v527_v12 }
  0x20   :  { %480 = vmatprep.subr.bf16.mxu1 %v577_v1  ;;  %p560_p3 = por %p559_p2, %p558_p1 }
  0x21   :  { %471 = vmatmul.mubr.bf16.vlgmr.msra.gmra.mrb[0].mxu0 %v28_v9 }
  0x22   :  { %510 = vmatprep.mubr.msk.bf16.mxu0 %vm578_vm0, %v577_v1  ;;  %495 = vmatpush3.bf16.msra.mxu0 %v533_v29  ;;  %p561_p4 = pnand %p560_p3, %p554_p0 }
  0x23   :  { %481 = vmatpush3.bf16.msra.mxu1 %v528_v13  ;;  %496 = vmatprep.subr.bf16.mxu0 %v577_v1 }
  0x24   :  { %482 = vmatprep.subr.bf16.mxu1 %v577_v1 }
  0x26   :  { %497 = vmatpush3.bf16.msra.mxu0 %v534_v30 }
  0x27   :  { %483 = vmatpush3.bf16.msra.mxu1 %v529_v14  ;;  %498 = vmatprep.subr.bf16.mxu0 %v577_v1 }
  0x28   :  { %484 = vmatprep.subr.bf16.mxu1 %v577_v1 }
  0x2a   :  { %499 = vmatpush3.bf16.msra.mxu0 %v535_v31 }
  0x2b   :  { %485 = vmatpush3.bf16.msra.mxu1 %v530_v15  ;;  %500 = vmatprep.subr.bf16.mxu0 %v577_v1 }
  0x2c   :  { %486 = vmatprep.subr.bf16.mxu1 %v577_v1 }
  0x2e   :  { %501 = vmatpush3.bf16.msra.mxu0 %v536_v32 }
  0x2f   :  { %487 = vmatpush3.bf16.msra.mxu1 %v531_v16  ;;  %502 = vmatprep.subr.bf16.mxu0 %v577_v1 }
  0x30   :  { %488 = vmatprep.subr.bf16.mxu1 %v577_v1 }
  0x32   :  { %503 = vmatpush3.bf16.msra.mxu0 %v537_v33 }
  0x33   :  { %489 = vmatpush3.bf16.msra.mxu1 %v532_v17  ;;  %504 = vmatprep.subr.bf16.mxu0 %v577_v1 }
  0x36   :  { %505 = vmatpush3.bf16.msra.mxu0 %v538_v34 }
  0x37   :  { %506 = vmatprep.subr.bf16.mxu0 %v577_v1 }
  0x3a   :  { %507 = vmatpush3.bf16.msra.mxu0 %v539_v35 }
  0x3b   :  { %508 = vmatprep.subr.bf16.mxu0 %v577_v1 }
  0x3e   :  { %509 = vmatpush3.bf16.msra.mxu0 %v540_v36 }
  0xf4   :  { %v134_v19 = vpop.f32.mrb[0].mxu0 }
  0xf5   :  { %v135_v20 = vadd.f32 %v397_v18, %v134_v19  ;;  %v472_v21 = vpop.f32.mrb[1].mxu0 }
  0xf6   :  { %v137_v22 = vpop.f32.mrb[2].mxu0 }
  0xf7   :  { %v406_v23 = vmul.f32 -1.442695, %v135_v20  ;;  %v473_v24 = vpop.f32.mrb[3].mxu0 }
  0xf9   :  { %541 = vpow2.f32 %v406_v23 }
 0x103   :  { %v542_v25 = vpop.eup %541 }
 0x104   :  { %v143_v26 = vadd.f32 1.0, %v542_v25 }
 0x106   :  { %543 = vrcp.f32 %v143_v26 }
 0x110   :  { %v544_v27 = vpop.eup %543 }
 0x111   :  { %v146_v28 = vpack.c.bf16 %v544_v27, %v544_v27 }
 0x113   :  { %491 = vmatmul.mubr.bf16.vlgmr.msra.gmra.mrb[0].mxu1 %v146_v28 }
 0x1e6   :  { %v252_v38 = vpop.f32.mrb[0].mxu1 }
 0x1e7   :  { %v253_v39 = vadd.f32 %v407_v37, %v252_v38  ;;  %v492_v40 = vpop.f32.mrb[1].mxu1 }
 0x1e8   :  { %v255_v41 = vpop.f32.mrb[2].mxu1 }
 0x1e9   :  { %v416_v42 = vmul.f32 -1.442695, %v253_v39  ;;  %v493_v43 = vpop.f32.mrb[3].mxu1 }
 0x1eb   :  { %545 = vpow2.f32 %v416_v42 }
 0x1f5   :  { %v546_v44 = vpop.eup %545 }
 0x1f6   :  { %v261_v45 = vadd.f32 1.0, %v546_v44 }
 0x1f8   :  { %547 = vrcp.f32 %v261_v45 }
 0x202   :  { %v548_v46 = vpop.eup %547 }
 0x203   :  { %v264_v47 = vpack.c.bf16 %v548_v46, %v548_v46 }
 0x205   :  { %511 = vmatmul.mubr.bf16.vlgmr.msra.gmra.mrb[4].mxu0 %v264_v47 }
 0x2d8   :  { %v370_v49 = vpop.f32.mrb[4].mxu0 }
 0x2d9   :  { %v371_v50 = vadd.f32 %v417_v48, %v370_v49  ;;  %v512_v51 = vpop.f32.mrb[5].mxu0 }
 0x2da   :  { %v373_v52 = vpop.f32.mrb[6].mxu0 }
 0x2db   :  { %v426_v53 = vmul.f32 -1.442695, %v371_v50  ;;  %v513_v54 = vpop.f32.mrb[7].mxu0 }
 0x2dd   :  { %549 = vpow2.f32 %v426_v53 }
 0x2e7   :  { %v550_v55 = vpop.eup %549 }
 0x2e8   :  { %v379_v56 = vadd.f32 1.0, %v550_v55 }
 0x2ea   :  { %551 = vrcp.f32 %v379_v56 }
 0x2f4   :  { %v552_v57 = vpop.eup %551 }
 0x2f5   :  { %382 = vst [vmem:[#allocation2] sm:$0xff] %v552_v57 }
 0x2f6   :  { %564 = shalt.err (!%p561_p4)
}
 0x2f7   :  { %s565_s30 = scalar_lea.hbm %s753_s7, 128 }
 0x2f8   :  { %p566_p5 = scmp.ne.s32.totalorder %s753_s7, %s565_s30  ;;  %p569_p6 = scmp.lt.u32.totalorder %s565_s30, %s753_s7 }
 0x2fa   :  { %p571_p7 = pnand %p569_p6, %p566_p5 }
 0x2fc   :  { %574 = shalt.err (!%p571_p7)
}
 0x2fd   :  { %392 = dma.vmem_to_hbm [thread:$0]  %s390_s27, 128, %s753_s7, [#allocation3]  }
 0x2fe   :  { %575 = dma.done.wait [#allocation3], 128  }
 0x2ff   :  { %576 = vsyncadd [#allocation3], 4294967168 }
 0x300   :  { %396 = vsyncpa [#allocation3], 1 }

</bundles_post_ra>
